<compile_context>
chip_gen: v5e
topology: v5e:2x2
jax: 0.10.0
libtpu: 0.0.40
codegen_flags: <defaults>
</compile_context>

<pallas_src>
import jax
import jax.numpy as jnp
from jax import lax
from jax.experimental import pallas as pl
from jax.experimental.pallas import tpu as pltpu

_NEG_BIG = -1e30   # finite "minus infinity" (avoids inf-inf NaN hazards)
_LANE = 128


def _round_up(n, m):
    return ((n + m - 1) // m) * m


def _pad2(a, rows, cols):
    return jnp.pad(a, ((0, rows - a.shape[0]), (0, cols - a.shape[1])))


def make_fnn_kernel(n_layers: int, batch: int, tile_b: int, act_fn, needs_row_mask: bool):
    """kernel(x, w0, b0, ..., w_{n-1}, b_{n-1}, out, m_scratch, s_scratch)."""

    def kernel(x_ref, *refs):
        params = refs[: 2 * n_layers]
        out_ref = refs[2 * n_layers]
        m_ref = refs[2 * n_layers + 1]   # running column-wise max      (1, D_out_pad)
        s_ref = refs[2 * n_layers + 2]   # running column-wise sum(exp) (1, D_out_pad)

        phase = pl.program_id(0)
        tile = pl.program_id(1)

        @pl.when((phase == 0) & (tile == 0))
        def _init():
            m_ref[...] = jnp.full_like(m_ref, _NEG_BIG)
            s_ref[...] = jnp.zeros_like(s_ref)

        # Forward pass for this batch tile (weights resident in VMEM).
        h = x_ref[...]
        for i in range(n_layers):
            w = params[2 * i][...]
            b = params[2 * i + 1][...]
            h = jnp.dot(h, w, preferred_element_type=jnp.float32) + b
            if i < n_layers - 1:
                h = act_fn(h)

        # Mask padded batch rows out of the dim=0 reduction (only if padding exists).
        if needs_row_mask:
            row = tile * tile_b + lax.broadcasted_iota(jnp.int32, (tile_b, 1), 0)
            h_masked = jnp.where(row < batch, h, _NEG_BIG)
        else:
            h_masked = h

        @pl.when(phase == 0)
        def _accumulate():
            tile_max = jnp.max(h_masked, axis=0, keepdims=True)
            m_old = m_ref[...]
            m_new = jnp.maximum(m_old, tile_max)
            s_ref[...] = s_ref[...] * jnp.exp(m_old - m_new) + jnp.sum(
                jnp.exp(h_masked - m_new), axis=0, keepdims=True)
            m_ref[...] = m_new

        @pl.when(phase == 1)
        def _finalize():
            lse = m_ref[...] + jnp.log(s_ref[...])
            out_ref[...] = (h - lse).astype(out_ref.dtype)

    return kernel


def fnn_forward(x, weights, biases, *, act_fn=None, tile_b=None):
    """x: [B, wide[0]] f32; weights[i]: [wide[i], wide[i+1]]; biases[i]: [1, wide[i+1]]."""
    if act_fn is None:
        act_fn = lambda v: jnp.maximum(v, 0.0)   # ReLU (generic `act` in the torch module)
    n_layers = len(weights)
    B, d_in = x.shape
    d_out = weights[-1].shape[1]

    # Lane-align every feature dim; sublane-align / tile the batch.
    dims = [d_in] + [w.shape[1] for w in weights]
    dims_p = [_round_up(d, _LANE) for d in dims]
    if tile_b is None:
        tile_b = max(8, min(512, _round_up(B, 8)))
    n_tiles = max(1, pl.cdiv(B, tile_b))
    b_pad = n_tiles * tile_b
    d_out_p = dims_p[-1]
    needs_row_mask = (b_pad != B)

    x_p = _pad2(x, b_pad, dims_p[0])
    args = [x_p]
    in_specs = [pl.BlockSpec((tile_b, dims_p[0]), lambda p, i: (i, 0))]
    for li in range(n_layers):
        w_p = _pad2(weights[li], dims_p[li], dims_p[li + 1])
        b_p = _pad2(biases[li].reshape(1, -1), 1, dims_p[li + 1])
        args.append(w_p)
        args.append(b_p)
        # Constant index_map -> weights/biases stay resident in VMEM (single DMA).
        in_specs.append(pl.BlockSpec(w_p.shape, lambda p, i: (0, 0)))
        in_specs.append(pl.BlockSpec(b_p.shape, lambda p, i: (0, 0)))

    # Phase-aware output index: every output block is visited (and written back)
    # exactly once, during phase 1.  Phase 0 pins block 0 and never writes it,
    # so no writeback is triggered until the real data is produced.
    out_specs = pl.BlockSpec((tile_b, d_out_p), lambda p, i: (p * i, 0))
    out_shape = jax.ShapeDtypeStruct((b_pad, d_out_p), x.dtype)

    kernel = make_fnn_kernel(n_layers, B, tile_b, act_fn, needs_row_mask)

    out_padded = pl.pallas_call(
        kernel,
        grid=(2, n_tiles),
        in_specs=in_specs,
        out_specs=out_specs,
        out_shape=out_shape,
        scratch_shapes=[
            pltpu.VMEM((1, d_out_p), jnp.float32),  # running max
            pltpu.VMEM((1, d_out_p), jnp.float32),  # running sum of exp
        ],
        compiler_params=pltpu.CompilerParams(
            # dim=0 softmax couples batch tiles (sequential reduction) -> both arbitrary.
            dimension_semantics=("arbitrary", "arbitrary")),
    )(*args)

    return out_padded[:B, :d_out]


def fnn_reference(x, weights, biases):
    h = x
    n = len(weights)
    for i, (w, b) in enumerate(zip(weights, biases)):
        h = h @ w + b
        if i < n - 1:
            h = jnp.maximum(h, 0.0)
    return jax.nn.log_softmax(h, axis=0)


if __name__ == "__main__":
    # Module config: wide = [32, 64, 48, 16], act = ReLU.
    wide = [32, 64, 48, 16]
    B = 200  # not a multiple of 8/128 -> exercises batch padding paths

    key = jax.random.PRNGKey(0)
    keys = jax.random.split(key, 2 * (len(wide) - 1) + 1)

    x = jax.random.normal(keys[0], (B, wide[0]), dtype=jnp.float32)

    weights, biases = [], []
    for i in range(len(wide) - 1):
        fan_in = wide[i]
        bound = 1.0 / (fan_in ** 0.5)
        w = jax.random.uniform(
            keys[1 + 2 * i], (wide[i], wide[i + 1]),
            minval=-bound, maxval=bound, dtype=jnp.float32)
        b = jax.random.uniform(
            keys[2 + 2 * i], (1, wide[i + 1]),
            minval=-bound, maxval=bound, dtype=jnp.float32)
        weights.append(w)
        biases.append(b)

    ref = fnn_reference(x, weights, biases)

    # 1) Auto tile (single batch tile, no row masking needed).
    out = jax.block_until_ready(fnn_forward(x, weights, biases))
    assert out.shape == (B, wide[-1])
    assert jnp.allclose(out, ref, atol=1e-4, rtol=1e-5), "mismatch vs reference (auto tile)"

    # 2) Forced small tile (multiple batch tiles + padded-row masking path).
    out2 = jax.block_until_ready(fnn_forward(x, weights, biases, tile_b=128))
    assert jnp.allclose(out2, ref, atol=1e-4, rtol=1e-5), "mismatch vs reference (tiled)"

    print("KERNEL_OK")
</pallas_src>

<mosaic_0001>
module attributes {stable_mosaic.version = 11 : i64} {
  func.func @kernel(%arg0: i32, %arg1: i32, %arg2: memref<200x128xf32, #tpu.memory_space<vmem>>, %arg3: memref<128x128xf32, #tpu.memory_space<vmem>>, %arg4: memref<1x128xf32, #tpu.memory_space<vmem>>, %arg5: memref<128x128xf32, #tpu.memory_space<vmem>>, %arg6: memref<1x128xf32, #tpu.memory_space<vmem>>, %arg7: memref<128x128xf32, #tpu.memory_space<vmem>>, %arg8: memref<1x128xf32, #tpu.memory_space<vmem>>, %arg9: memref<200x128xf32, #tpu.memory_space<vmem>>, %arg10: memref<1x128xf32, #tpu.memory_space<vmem>>, %arg11: memref<1x128xf32, #tpu.memory_space<vmem>>) attributes {dimension_semantics = [#tpu.dimension_semantics<arbitrary>, #tpu.dimension_semantics<arbitrary>], iteration_bounds = array<i64: 2, 1>, scalar_prefetch = 0 : i64, scratch_operands = 2 : i64, tpu.core_type = #tpu.core_type<tc>, window_params = [{transform_indices = @transform_0, window_bounds = array<i64: 200, 128>}, {pipeline_mode = #tpu.pipeline_mode<synchronous>, transform_indices = @transform_1, window_bounds = array<i64: 128, 128>}, {pipeline_mode = #tpu.pipeline_mode<synchronous>, transform_indices = @transform_2, window_bounds = array<i64: 1, 128>}, {pipeline_mode = #tpu.pipeline_mode<synchronous>, transform_indices = @transform_3, window_bounds = array<i64: 128, 128>}, {pipeline_mode = #tpu.pipeline_mode<synchronous>, transform_indices = @transform_4, window_bounds = array<i64: 1, 128>}, {pipeline_mode = #tpu.pipeline_mode<synchronous>, transform_indices = @transform_5, window_bounds = array<i64: 128, 128>}, {pipeline_mode = #tpu.pipeline_mode<synchronous>, transform_indices = @transform_6, window_bounds = array<i64: 1, 128>}, {transform_indices = @transform_7, window_bounds = array<i64: 200, 128>}]} {
    %c0_i32 = arith.constant 0 : i32
    %0 = arith.cmpi eq, %arg0, %c0_i32 : i32
    %c0_i32_0 = arith.constant 0 : i32
    %1 = arith.cmpi eq, %arg1, %c0_i32_0 : i32
    %2 = arith.andi %0, %1 : i1
    %3 = arith.extui %2 : i1 to i32
    %c0_i32_1 = arith.constant 0 : i32
    %4 = arith.cmpi ne, %3, %c0_i32_1 : i32
    scf.if %4 {
      %cst_22 = arith.constant -1.000000e+30 : f32
      %31 = vector.broadcast %cst_22 : f32 to vector<1x128xf32>
      %c0_23 = arith.constant 0 : index
      %c0_24 = arith.constant 0 : index
      %32 = vector.load %arg10[%c0_23, %c0_24] : memref<1x128xf32, #tpu.memory_space<vmem>>, vector<1x128xf32>
      tpu.vector_store %arg10[%c0_23, %c0_24], %31 {strides = array<i32>} : memref<1x128xf32, #tpu.memory_space<vmem>>, vector<1x128xf32>,
      %cst_25 = arith.constant 0.000000e+00 : f32
      %33 = vector.broadcast %cst_25 : f32 to vector<1x128xf32>
      %c0_26 = arith.constant 0 : index
      %c0_27 = arith.constant 0 : index
      %34 = vector.load %arg11[%c0_26, %c0_27] : memref<1x128xf32, #tpu.memory_space<vmem>>, vector<1x128xf32>
      tpu.vector_store %arg11[%c0_26, %c0_27], %33 {strides = array<i32>} : memref<1x128xf32, #tpu.memory_space<vmem>>, vector<1x128xf32>,
    } else {
    }
    %c0 = arith.constant 0 : index
    %c0_2 = arith.constant 0 : index
    %5 = vector.load %arg2[%c0, %c0_2] : memref<200x128xf32, #tpu.memory_space<vmem>>, vector<200x128xf32>
    %c0_3 = arith.constant 0 : index
    %c0_4 = arith.constant 0 : index
    %6 = vector.load %arg3[%c0_3, %c0_4] : memref<128x128xf32, #tpu.memory_space<vmem>>, vector<128x128xf32>
    %c0_5 = arith.constant 0 : index
    %c0_6 = arith.constant 0 : index
    %7 = vector.load %arg4[%c0_5, %c0_6] : memref<1x128xf32, #tpu.memory_space<vmem>>, vector<1x128xf32>
    %cst = arith.constant dense<0.000000e+00> : vector<200x128xf32>
    %8 = tpu.matmul %5, %6, %cst {dimension_numbers = #tpu.dot_dimension_numbers<[1], [0], [0], [1], [0, 0, 1, 1], [], []>} : vector<200x128xf32>, vector<128x128xf32>, vector<200x128xf32> -> vector<200x128xf32>
    %9 = vector.broadcast %7 : vector<1x128xf32> to vector<200x128xf32>
    %10 = arith.addf %8, %9 : vector<200x128xf32>
    %cst_7 = arith.constant 0.000000e+00 : f32
    %11 = vector.broadcast %cst_7 : f32 to vector<200x128xf32>
    %12 = arith.maximumf %10, %11 : vector<200x128xf32>
    %c0_8 = arith.constant 0 : index
    %c0_9 = arith.constant 0 : index
    %13 = vector.load %arg5[%c0_8, %c0_9] : memref<128x128xf32, #tpu.memory_space<vmem>>, vector<128x128xf32>
    %c0_10 = arith.constant 0 : index
    %c0_11 = arith.constant 0 : index
    %14 = vector.load %arg6[%c0_10, %c0_11] : memref<1x128xf32, #tpu.memory_space<vmem>>, vector<1x128xf32>
    %cst_12 = arith.constant dense<0.000000e+00> : vector<200x128xf32>
    %15 = tpu.matmul %12, %13, %cst_12 {dimension_numbers = #tpu.dot_dimension_numbers<[1], [0], [0], [1], [0, 0, 1, 1], [], []>} : vector<200x128xf32>, vector<128x128xf32>, vector<200x128xf32> -> vector<200x128xf32>
    %16 = vector.broadcast %14 : vector<1x128xf32> to vector<200x128xf32>
    %17 = arith.addf %15, %16 : vector<200x128xf32>
    %cst_13 = arith.constant 0.000000e+00 : f32
    %18 = vector.broadcast %cst_13 : f32 to vector<200x128xf32>
    %19 = arith.maximumf %17, %18 : vector<200x128xf32>
    %c0_14 = arith.constant 0 : index
    %c0_15 = arith.constant 0 : index
    %20 = vector.load %arg7[%c0_14, %c0_15] : memref<128x128xf32, #tpu.memory_space<vmem>>, vector<128x128xf32>
    %c0_16 = arith.constant 0 : index
    %c0_17 = arith.constant 0 : index
    %21 = vector.load %arg8[%c0_16, %c0_17] : memref<1x128xf32, #tpu.memory_space<vmem>>, vector<1x128xf32>
    %cst_18 = arith.constant dense<0.000000e+00> : vector<200x128xf32>
    %22 = tpu.matmul %19, %20, %cst_18 {dimension_numbers = #tpu.dot_dimension_numbers<[1], [0], [0], [1], [0, 0, 1, 1], [], []>} : vector<200x128xf32>, vector<128x128xf32>, vector<200x128xf32> -> vector<200x128xf32>
    %23 = vector.broadcast %21 : vector<1x128xf32> to vector<200x128xf32>
    %24 = arith.addf %22, %23 : vector<200x128xf32>
    %c0_i32_19 = arith.constant 0 : i32
    %25 = arith.cmpi eq, %arg0, %c0_i32_19 : i32
    %26 = arith.extui %25 : i1 to i32
    %c0_i32_20 = arith.constant 0 : i32
    %27 = arith.cmpi ne, %26, %c0_i32_20 : i32
    scf.if %27 {
      %cst_22 = arith.constant dense<0xFF800000> : vector<128xf32>
      %31 = vector.multi_reduction <maximumf>, %24, %cst_22 [0] : vector<200x128xf32> to vector<128xf32>
      %32 = vector.shape_cast %31 : vector<128xf32> to vector<1x128xf32>
      %c0_23 = arith.constant 0 : index
      %c0_24 = arith.constant 0 : index
      %33 = vector.load %arg10[%c0_23, %c0_24] : memref<1x128xf32, #tpu.memory_space<vmem>>, vector<1x128xf32>
      %34 = arith.maximumf %33, %32 : vector<1x128xf32>
      %c0_25 = arith.constant 0 : index
      %c0_26 = arith.constant 0 : index
      %35 = vector.load %arg11[%c0_25, %c0_26] : memref<1x128xf32, #tpu.memory_space<vmem>>, vector<1x128xf32>
      %36 = arith.subf %33, %34 : vector<1x128xf32>
      %37 = math.exp %36 : vector<1x128xf32>
      %38 = arith.mulf %35, %37 : vector<1x128xf32>
      %39 = vector.broadcast %34 : vector<1x128xf32> to vector<200x128xf32>
      %40 = arith.subf %24, %39 : vector<200x128xf32>
      %41 = math.exp %40 : vector<200x128xf32>
      %cst_27 = arith.constant dense<0.000000e+00> : vector<128xf32>
      %42 = vector.multi_reduction <add>, %41, %cst_27 [0] : vector<200x128xf32> to vector<128xf32>
      %43 = vector.shape_cast %42 : vector<128xf32> to vector<1x128xf32>
      %44 = arith.addf %38, %43 : vector<1x128xf32>
      %c0_28 = arith.constant 0 : index
      %c0_29 = arith.constant 0 : index
      %45 = vector.load %arg11[%c0_28, %c0_29] : memref<1x128xf32, #tpu.memory_space<vmem>>, vector<1x128xf32>
      tpu.vector_store %arg11[%c0_28, %c0_29], %44 {strides = array<i32>} : memref<1x128xf32, #tpu.memory_space<vmem>>, vector<1x128xf32>,
      %c0_30 = arith.constant 0 : index
      %c0_31 = arith.constant 0 : index
      %46 = vector.load %arg10[%c0_30, %c0_31] : memref<1x128xf32, #tpu.memory_space<vmem>>, vector<1x128xf32>
      tpu.vector_store %arg10[%c0_30, %c0_31], %34 {strides = array<i32>} : memref<1x128xf32, #tpu.memory_space<vmem>>, vector<1x128xf32>,
    } else {
    }
    %c1_i32 = arith.constant 1 : i32
    %28 = arith.cmpi eq, %arg0, %c1_i32 : i32
    %29 = arith.extui %28 : i1 to i32
    %c0_i32_21 = arith.constant 0 : i32
    %30 = arith.cmpi ne, %29, %c0_i32_21 : i32
    scf.if %30 {
      %c0_22 = arith.constant 0 : index
      %c0_23 = arith.constant 0 : index
      %31 = vector.load %arg10[%c0_22, %c0_23] : memref<1x128xf32, #tpu.memory_space<vmem>>, vector<1x128xf32>
      %c0_24 = arith.constant 0 : index
      %c0_25 = arith.constant 0 : index
      %32 = vector.load %arg11[%c0_24, %c0_25] : memref<1x128xf32, #tpu.memory_space<vmem>>, vector<1x128xf32>
      %33 = math.log %32 : vector<1x128xf32>
      %34 = arith.addf %31, %33 : vector<1x128xf32>
      %35 = vector.broadcast %34 : vector<1x128xf32> to vector<200x128xf32>
      %36 = arith.subf %24, %35 : vector<200x128xf32>
      %c0_26 = arith.constant 0 : index
      %c0_27 = arith.constant 0 : index
      %37 = vector.load %arg9[%c0_26, %c0_27] : memref<200x128xf32, #tpu.memory_space<vmem>>, vector<200x128xf32>
      tpu.vector_store %arg9[%c0_26, %c0_27], %36 {strides = array<i32>} : memref<200x128xf32, #tpu.memory_space<vmem>>, vector<200x128xf32>,
    } else {
    }
    return
  }
  func.func @transform_0(%arg0: i32, %arg1: i32) -> (i32, i32) {
    %c0_i32 = arith.constant 0 : i32
    %c0_i32_0 = arith.constant 0 : i32
    return %arg1, %c0_i32 : i32, i32
  }
  func.func @transform_1(%arg0: i32, %arg1: i32) -> (i32, i32) {
    %c0_i32 = arith.constant 0 : i32
    %c0_i32_0 = arith.constant 0 : i32
    %c0_i32_1 = arith.constant 0 : i32
    return %c0_i32, %c0_i32_0 : i32, i32
  }
  func.func @transform_2(%arg0: i32, %arg1: i32) -> (i32, i32) {
    %c0_i32 = arith.constant 0 : i32
    %c0_i32_0 = arith.constant 0 : i32
    %c0_i32_1 = arith.constant 0 : i32
    return %c0_i32, %c0_i32_0 : i32, i32
  }
  func.func @transform_3(%arg0: i32, %arg1: i32) -> (i32, i32) {
    %c0_i32 = arith.constant 0 : i32
    %c0_i32_0 = arith.constant 0 : i32
    %c0_i32_1 = arith.constant 0 : i32
    return %c0_i32, %c0_i32_0 : i32, i32
  }
  func.func @transform_4(%arg0: i32, %arg1: i32) -> (i32, i32) {
    %c0_i32 = arith.constant 0 : i32
    %c0_i32_0 = arith.constant 0 : i32
    %c0_i32_1 = arith.constant 0 : i32
    return %c0_i32, %c0_i32_0 : i32, i32
  }
  func.func @transform_5(%arg0: i32, %arg1: i32) -> (i32, i32) {
    %c0_i32 = arith.constant 0 : i32
    %c0_i32_0 = arith.constant 0 : i32
    %c0_i32_1 = arith.constant 0 : i32
    return %c0_i32, %c0_i32_0 : i32, i32
  }
  func.func @transform_6(%arg0: i32, %arg1: i32) -> (i32, i32) {
    %c0_i32 = arith.constant 0 : i32
    %c0_i32_0 = arith.constant 0 : i32
    %c0_i32_1 = arith.constant 0 : i32
    return %c0_i32, %c0_i32_0 : i32, i32
  }
  func.func @transform_7(%arg0: i32, %arg1: i32) -> (i32, i32) {
    %0 = arith.muli %arg0, %arg1 : i32
    %c0_i32 = arith.constant 0 : i32
    %c0_i32_0 = arith.constant 0 : i32
    return %0, %c0_i32 : i32, i32
  }
}

</mosaic_0001>

<bundles_post_ra>
// kernel: tpu_custom_call.1
= control target key start
LH: loop header
LB: loop body
LE: loop exit
PB: predicated region body
PF: predicated region fallthrough
CT: control target
= control target key end

     0   :  { %12 = vsyncpa [#allocation5], 0  ;;  %s1867_s0 = inlined_call_operand.hbm [shape: f32[200,128], index: 0, kind: input, shape index: {}]   ;;  %s1868_s1 = inlined_call_operand.hbm [shape: f32[128,128], index: 1, kind: input, shape index: {}]   ;;  %s1869_s2 = inlined_call_operand.vmem [shape: f32[1,128], index: 2, kind: input, shape index: {}]   ;;  %s1870_s3 = inlined_call_operand.hbm [shape: f32[128,128], index: 3, kind: input, shape index: {}]   ;;  %s1871_s4 = inlined_call_operand.vmem [shape: f32[1,128], index: 4, kind: input, shape index: {}]   ;;  %s1872_s5 = inlined_call_operand.hbm [shape: f32[128,128], index: 5, kind: input, shape index: {}]   ;;  %s1873_s6 = inlined_call_operand.vmem [shape: f32[1,128], index: 6, kind: input, shape index: {}]   ;;  %s1874_s7 = inlined_call_operand.hbm [shape: f32[200,128], index: 7, kind: output, shape index: {}]  }
   0x1   :  { %13 = vsyncpa [#allocation8], 0 }
   0x2   :  { %14 = vsyncpa [#allocation11], 0 }
   0x3   :  { %15 = vsyncpa [#allocation6], 0 }
   0x4   :  { %17 = vsyncpa [#allocation6 + $0x1], 0  ;;  %s1546_s24 = smov 0   ;;  %s1548_s25 = smov 0  }
   0x5   :  { %s1550_s26 = smov 0  }
   0x6 LB: > { %s1099_s27 = sadd.s32 4294967295, %s1493_s26   ;;  %s1100_s28 = sadd.s32 4294967294, %s1493_s26   ;;  %s1493_s26 = sphi %s1550_s26, %s23_s26   ;;  %s1489_s25 = sphi %s1548_s25, %s1879_s25   ;;  %s1485_s24 = sphi %s1546_s24, %s1878_s24  }
   0x7   : > { %p1101_p0 = scmp.ge.s32.totalorder %s1493_s26, 1  ;;  %p220_p1 = scmp.lt.s32.totalorder %s1493_s26, 3 }
   0x8   : > { %p1567_p2 = scmp.eq.s32.totalorder %s1099_s27, 0  ;;  %s248_s10 = sshll.u32 %s1868_s1, 4  ;;  %s249_s10 = int_to_ptr.hbm [resolvable:$true] %s248_s10 }
   0x9   : > { %p1571_p3 = pnand %p1101_p0, %p220_p1  ;;  %s1495_s11 = smov [#allocation7]  }
   0xa   : > { %s250_s12 = sshll.u32 %s1495_s11, 4  ;;  %s35_s14 = sadd.s32 1, %s1489_s25  ;;  %s251_s12 = int_to_ptr.vmem [resolvable:$true] %s250_s12 }
   0xb   : > { %p1187_p4 = pneg %p1571_p3  ;;  %s1496_s15 = smov 128  }
   0xc   : > { %s1497_s16 = smov 8   ;;  %p37_p6 = scmp.ge.s32.totalorder %s35_s14, 2 }
   0xd   : > { %p1582_p5 = pnand %p1567_p2, %p1187_p4  ;;  %s234_s19 = sshll.u32 %s1867_s0, 4  ;;  %s235_s19 = int_to_ptr.hbm [resolvable:$true] %s234_s19 }
   0xe   : > { %s1881_s14 = smov (%p37_p6, %s35_s14), 0  ;;  %s1498_s20 = smov [#allocation4]  }
   0xf   : > { %1193 = dma.hbm_to_vmem [thread:$0]  (!%p1582_p5), %s249_s10, 2048, %s251_s12, [#allocation8], %s1496_s15, %s1496_s15, %s1497_s16  }
  0x10   : > { %s236_s21 = sshll.u32 %s1498_s20, 4  ;;  %s265_s8 = sshll.u32 %s1870_s3, 4  ;;  %s237_s21 = int_to_ptr.vmem [resolvable:$true] %s236_s21  ;;  %s266_s8 = int_to_ptr.hbm [resolvable:$true] %s265_s8 }
  0x11   : > { %1190 = dma.hbm_to_vmem [thread:$0]  (!%p1582_p5), %s235_s19, 3200, %s237_s21, [#allocation5], %s1496_s15, %s1496_s15, %s1497_s16  }
  0x12   : > { %s282_s11 = sshll.u32 %s1872_s5, 4  ;;  %s1499_s12 = smov [#allocation9]   ;;  %s283_s11 = int_to_ptr.hbm [resolvable:$true] %s282_s11 }
  0x13   : > { %s267_s17 = sshll.u32 %s1499_s12, 4  ;;  %s1500_s18 = smov [#allocation10]   ;;  %s268_s17 = int_to_ptr.vmem [resolvable:$true] %s267_s17 }
  0x14   : > { %1196 = dma.hbm_to_vmem [thread:$0]  (!%p1582_p5), %s266_s8, 2048, %s268_s17, [#allocation8], %s1496_s15, %s1496_s15, %s1497_s16  }
  0x15   : > { %s284_s20 = sshll.u32 %s1500_s18, 4  ;;  %303 = sbr.rel (%p1571_p3) target bundleno = 766 (0x2fe), region = 48  ;;  %s285_s20 = int_to_ptr.vmem [resolvable:$true] %s284_s20 }
  0x16   : > { %1199 = dma.hbm_to_vmem [thread:$0]  (!%p1582_p5), %s283_s11, 2048, %s285_s20, [#allocation11], %s1496_s15, %s1496_s15, %s1497_s16  }
  0x1a   : > { %1468 = dma.done.wait (%p1567_p2), [#allocation5], 3200  }
  0x1b   : > { %1470 = vsyncadd (%p1567_p2), [#allocation5], 4294964096 }
  0x1c   : > { %1472 = dma.done.wait (%p1567_p2), [#allocation8], 4096  }
  0x1d   : > { %1474 = vsyncadd (%p1567_p2), [#allocation8], 4294963200 }
  0x1e   : > { %1476 = dma.done.wait (%p1567_p2), [#allocation11], 2048  }
  0x1f   : > { %1478 = vsyncadd (%p1567_p2), [#allocation11], 4294965248  ;;  %p349_p7 = scmp.eq.s32.totalorder %s1485_s24, 0 }
  0x20   : > { %v1501_v0 = vmov (%p349_p7), -1e+30   ;;  %v1502_v1 = vmov (%p349_p7), 0.0  }
  0x21   : > { %354 = sbr.rel (!%p349_p7) target bundleno = 38 (0x26), region = 68  ;;  %355 = vst [vmem:[#allocation2] sm:$0x1] (%p349_p7), %v1501_v0 }
  0x22   : > { %356 = vst [vmem:[#allocation3] sm:$0x1] (%p349_p7), %v1502_v1 }
  0x26 PF: > { %v397_v2 = vld [vmem:[#allocation7 + $0x78] sm:$0xff]  ;;  %v396_v3 = vld [vmem:[#allocation7 + $0x70] sm:$0xff]  ;;  %v395_v4 = vld [vmem:[#allocation7 + $0x68] sm:$0xff]  ;;  %p1112_p8 = scmp.ne.s32.totalorder %s1485_s24, 0 }
  0x27   : > { %402 = vmatpush.msra.mxu0 %v397_v2  ;;  %1119 = vmatpush.msra.mxu3 %v397_v2  ;;  %v394_v5 = vld [vmem:[#allocation7 + $0x60] sm:$0xff]  ;;  %v393_v6 = vld [vmem:[#allocation7 + $0x58] sm:$0xff]  ;;  %v392_v7 = vld [vmem:[#allocation7 + $0x50] sm:$0xff] }
  0x28   : > { %v391_v8 = vld [vmem:[#allocation7 + $0x48] sm:$0xff]  ;;  %v390_v9 = vld [vmem:[#allocation7 + $0x40] sm:$0xff]  ;;  %v389_v10 = vld [vmem:[#allocation7 + $0x38] sm:$0xff] }
  0x29   : > { %403 = vmatpush.msra.mxu0 %v396_v3  ;;  %1120 = vmatpush.msra.mxu3 %v396_v3  ;;  %v388_v11 = vld [vmem:[#allocation7 + $0x30] sm:$0xff]  ;;  %v387_v12 = vld [vmem:[#allocation7 + $0x28] sm:$0xff]  ;;  %v386_v13 = vld [vmem:[#allocation7 + $0x20] sm:$0xff] }
  0x2a   : > { %v385_v14 = vld [vmem:[#allocation7 + $0x18] sm:$0xff]  ;;  %v384_v15 = vld [vmem:[#allocation7 + $0x10] sm:$0xff]  ;;  %v383_v16 = vld [vmem:[#allocation7 + $0x8] sm:$0xff] }
  0x2b   : > { %404 = vmatpush.msra.mxu0 %v395_v4  ;;  %1121 = vmatpush.msra.mxu3 %v395_v4  ;;  %v382_v17 = vld [vmem:[#allocation7] sm:$0xff]  ;;  %v357_v18 = vld [vmem:[#allocation4] sm:$0xff]  ;;  %v359_v20 = vld [vmem:[#allocation4 + $0x10] sm:$0xff] }
  0x2c   : > { %v358_v19 = vld [vmem:[#allocation4 + $0x8] sm:$0xff]  ;;  %v360_v21 = vld [vmem:[#allocation4 + $0x18] sm:$0xff]  ;;  %v361_v22 = vld [vmem:[#allocation4 + $0x20] sm:$0xff] }
  0x2d   : > { %405 = vmatpush.msra.mxu0 %v394_v5  ;;  %1122 = vmatpush.msra.mxu3 %v394_v5  ;;  %v362_v23 = vld [vmem:[#allocation4 + $0x28] sm:$0xff]  ;;  %v363_v24 = vld [vmem:[#allocation4 + $0x30] sm:$0xff]  ;;  %v364_v25 = vld [vmem:[#allocation4 + $0x38] sm:$0xff] }
  0x2e   : > { %v376_v26 = vld [vmem:[#allocation4 + $0x98] sm:$0xff]  ;;  %v365_v27 = vld [vmem:[#allocation4 + $0x40] sm:$0xff]  ;;  %v532_v31 = vld [vmem:[#allocation9 + $0x68] sm:$0xff] }
  0x2f   : > { %406 = vmatpush.msra.mxu0 %v393_v6  ;;  %1123 = vmatpush.msra.mxu3 %v393_v6  ;;  %v534_v28 = vld [vmem:[#allocation9 + $0x78] sm:$0xff]  ;;  %v533_v30 = vld [vmem:[#allocation9 + $0x70] sm:$0xff]  ;;  %v366_v32 = vld [vmem:[#allocation4 + $0x48] sm:$0xff] }
  0x30   : > { %v377_v29 = vld [vmem:[#allocation4 + $0xa0] sm:$0xff]  ;;  %539 = vmatpush.msra.mxu1 %v534_v28  ;;  %v531_v33 = vld [vmem:[#allocation9 + $0x60] sm:$0xff]  ;;  %v529_v36 = vld [vmem:[#allocation9 + $0x50] sm:$0xff] }
  0x31   : > { %407 = vmatpush.msra.mxu0 %v392_v7  ;;  %1124 = vmatpush.msra.mxu3 %v392_v7  ;;  %v530_v34 = vld [vmem:[#allocation9 + $0x58] sm:$0xff]  ;;  %v378_v35 = vld [vmem:[#allocation4 + $0xa8] sm:$0xff]  ;;  %v528_v37 = vld [vmem:[#allocation9 + $0x48] sm:$0xff] }
  0x32   : > { %540 = vmatpush.msra.mxu1 %v533_v30  ;;  %v367_v38 = vld [vmem:[#allocation4 + $0x50] sm:$0xff]  ;;  %v527_v39 = vld [vmem:[#allocation9 + $0x40] sm:$0xff]  ;;  %v526_v40 = vld [vmem:[#allocation9 + $0x38] sm:$0xff] }
  0x33   : > { %408 = vmatpush.msra.mxu0 %v391_v8  ;;  %1125 = vmatpush.msra.mxu3 %v391_v8  ;;  %v379_v41 = vld [vmem:[#allocation4 + $0xb0] sm:$0xff]  ;;  %v525_v42 = vld [vmem:[#allocation9 + $0x30] sm:$0xff]  ;;  %v523_v45 = vld [vmem:[#allocation9 + $0x20] sm:$0xff] }
  0x34   : > { %541 = vmatpush.msra.mxu1 %v532_v31  ;;  %v524_v43 = vld [vmem:[#allocation9 + $0x28] sm:$0xff]  ;;  %v368_v44 = vld [vmem:[#allocation4 + $0x58] sm:$0xff]  ;;  %v522_v46 = vld [vmem:[#allocation9 + $0x18] sm:$0xff] }
  0x35   : > { %409 = vmatpush.msra.mxu0 %v390_v9  ;;  %1126 = vmatpush.msra.mxu3 %v390_v9  ;;  %v380_v47 = vld [vmem:[#allocation4 + $0xb8] sm:$0xff]  ;;  %v369_v49 = vld [vmem:[#allocation4 + $0x60] sm:$0xff]  ;;  %v520_v50 = vld [vmem:[#allocation9 + $0x8] sm:$0xff] }
  0x36   : > { %542 = vmatpush.msra.mxu1 %v531_v33  ;;  %v521_v48 = vld [vmem:[#allocation9 + $0x10] sm:$0xff]  ;;  %v519_v51 = vld [vmem:[#allocation9] sm:$0xff]  ;;  %v381_v52 = vld [vmem:[#allocation4 + $0xc0] sm:$0xff] }
  0x37   : > { %410 = vmatpush.msra.mxu0 %v389_v10  ;;  %1127 = vmatpush.msra.mxu3 %v389_v10  ;;  %v370_v53 = vld [vmem:[#allocation4 + $0x68] sm:$0xff]  ;;  %v371_v54 = vld [vmem:[#allocation4 + $0x70] sm:$0xff]  ;;  %v372_v55 = vld [vmem:[#allocation4 + $0x78] sm:$0xff] }
  0x38   : > { %543 = vmatpush.msra.mxu1 %v530_v34  ;;  %v1624_v56 = vld [vmem:[%s1869_s2] ss:$0 sm:$0xff]  ;;  %v373_v58 = vld [vmem:[#allocation4 + $0x80] sm:$0xff]  ;;  %v374_v62 = vld [vmem:[#allocation4 + $0x88] sm:$0xff] }
  0x39   : > { %411 = vmatpush.msra.mxu0 %v388_v11  ;;  %1128 = vmatpush.msra.mxu3 %v388_v11  ;;  %v375_v2 = vld [vmem:[#allocation4 + $0x90] sm:$0xff] }
  0x3a   : > { %544 = vmatpush.msra.mxu1 %v529_v36 }
  0x3b   : > { %412 = vmatpush.msra.mxu0 %v387_v12  ;;  %1129 = vmatpush.msra.mxu3 %v387_v12 }
  0x3c   : > { %545 = vmatpush.msra.mxu1 %v528_v37 }
  0x3d   : > { %413 = vmatpush.msra.mxu0 %v386_v13  ;;  %1130 = vmatpush.msra.mxu3 %v386_v13 }
  0x3e   : > { %546 = vmatpush.msra.mxu1 %v527_v39 }
  0x3f   : > { %414 = vmatpush.msra.mxu0 %v385_v14  ;;  %1131 = vmatpush.msra.mxu3 %v385_v14 }
  0x40   : > { %547 = vmatpush.msra.mxu1 %v526_v40 }
  0x41   : > { %415 = vmatpush.msra.mxu0 %v384_v15  ;;  %1132 = vmatpush.msra.mxu3 %v384_v15 }
  0x42   : > { %548 = vmatpush.msra.mxu1 %v525_v42 }
  0x43   : > { %416 = vmatpush.msra.mxu0 %v383_v16  ;;  %1133 = vmatpush.msra.mxu3 %v383_v16 }
  0x44   : > { %549 = vmatpush.msra.mxu1 %v524_v43 }
  0x45   : > { %417 = vmatpush.msra.mxu0 %v382_v17  ;;  %1134 = vmatpush.msra.mxu3 %v382_v17 }
  0x46   : > { %418 = vmatmul.f32.vlgmr.msra.gmra.mxu0 %v357_v18  ;;  %475 = vmatmul.f32.vlgmr.msra.gmra.mxu3 %v376_v26  ;;  %v671_v26 = vld [vmem:[#allocation10 + $0x78] sm:$0xff] }
  0x47   : > { %1135 = vmatpush.msrb.mxu3 %v534_v28  ;;  %550 = vmatpush.msra.mxu1 %v523_v45 }
  0x48   : > { %676 = vmatpush.msra.mxu2 %v671_v26 }
  0x49   : > { %1136 = vmatpush.msrb.mxu3 %v533_v30  ;;  %551 = vmatpush.msra.mxu1 %v522_v46 }
  0x4b   : > { %1137 = vmatpush.msrb.mxu3 %v532_v31  ;;  %552 = vmatpush.msra.mxu1 %v521_v48 }
  0x4d   : > { %1138 = vmatpush.msrb.mxu3 %v531_v33  ;;  %553 = vmatpush.msra.mxu1 %v520_v50  ;;  %v669_v33 = vld [vmem:[#allocation10 + $0x68] sm:$0xff] }
  0x4e   : > { %421 = vmatmul.f32.gmra.mxu0 %v358_v19  ;;  %478 = vmatmul.f32.gmra.mxu3 %v377_v29  ;;  %v670_v29 = vld [vmem:[#allocation10 + $0x70] sm:$0xff] }
  0x4f   : > { %1139 = vmatpush.msrb.mxu3 %v530_v34  ;;  %554 = vmatpush.msra.mxu1 %v519_v51 }
  0x50   : > { %677 = vmatpush.msra.mxu2 %v670_v29 }
  0x51   : > { %1140 = vmatpush.msrb.mxu3 %v529_v36  ;;  %v667_v36 = vld [vmem:[#allocation10 + $0x58] sm:$0xff] }
  0x52   : > { %678 = vmatpush.msra.mxu2 %v669_v33 }
  0x53   : > { %1141 = vmatpush.msrb.mxu3 %v528_v37 }
  0x55   : > { %1142 = vmatpush.msrb.mxu3 %v527_v39  ;;  %v666_v39 = vld [vmem:[#allocation10 + $0x50] sm:$0xff] }
  0x56   : > { %424 = vmatmul.f32.gmra.mxu0 %v359_v20  ;;  %481 = vmatmul.f32.gmra.mxu3 %v378_v35  ;;  %v668_v35 = vld [vmem:[#allocation10 + $0x60] sm:$0xff] }
  0x57   : > { %1143 = vmatpush.msrb.mxu3 %v526_v40  ;;  %679 = vmatpush.msra.mxu2 %v668_v35 }
  0x59   : > { %1144 = vmatpush.msrb.mxu3 %v525_v42  ;;  %680 = vmatpush.msra.mxu2 %v667_v36 }
  0x5b   : > { %1145 = vmatpush.msrb.mxu3 %v524_v43  ;;  %681 = vmatpush.msra.mxu2 %v666_v39  ;;  %v665_v43 = vld [vmem:[#allocation10 + $0x48] sm:$0xff] }
  0x5d   : > { %1146 = vmatpush.msrb.mxu3 %v523_v45  ;;  %682 = vmatpush.msra.mxu2 %v665_v43  ;;  %v664_v45 = vld [vmem:[#allocation10 + $0x40] sm:$0xff] }
  0x5e   : > { %427 = vmatmul.f32.gmra.mxu0 %v360_v21  ;;  %484 = vmatmul.f32.gmra.mxu3 %v379_v41 }
  0x5f   : > { %1147 = vmatpush.msrb.mxu3 %v522_v46  ;;  %683 = vmatpush.msra.mxu2 %v664_v45  ;;  %v663_v46 = vld [vmem:[#allocation10 + $0x38] sm:$0xff] }
  0x61   : > { %1148 = vmatpush.msrb.mxu3 %v521_v48  ;;  %684 = vmatpush.msra.mxu2 %v663_v46 }
  0x63   : > { %1149 = vmatpush.msrb.mxu3 %v520_v50 }
  0x65   : > { %1150 = vmatpush.msrb.mxu3 %v519_v51 }
  0x66   : > { %430 = vmatmul.f32.gmra.mxu0 %v361_v22  ;;  %487 = vmatmul.f32.gmra.mxu3 %v380_v47 }
  0x67   : > { %1151 = vmatpush.msra.mxu3 %v671_v26 }
  0x69   : > { %1152 = vmatpush.msra.mxu3 %v670_v29 }
  0x6b   : > { %1153 = vmatpush.msra.mxu3 %v669_v33 }
  0x6d   : > { %1154 = vmatpush.msra.mxu3 %v668_v35 }
  0x6e   : > { %433 = vmatmul.f32.gmra.mxu0 %v362_v23  ;;  %490 = vmatmul.f32.gmra.mxu3 %v381_v52 }
  0x6f   : > { %1155 = vmatpush.msra.mxu3 %v667_v36 }
  0x71   : > { %1156 = vmatpush.msra.mxu3 %v666_v39 }
  0x73   : > { %1157 = vmatpush.msra.mxu3 %v665_v43 }
  0x75   : > { %1158 = vmatpush.msra.mxu3 %v664_v45 }
  0x76   : > { %436 = vmatmul.f32.gmra.mxu0 %v363_v24 }
  0x77   : > { %1159 = vmatpush.msra.mxu3 %v663_v46 }
  0x7e   : > { %439 = vmatmul.f32.gmra.mxu0 %v364_v25 }
  0x86   : > { %442 = vmatmul.f32.gmra.mxu0 %v365_v27 }
  0x8e   : > { %445 = vmatmul.f32.gmra.mxu0 %v366_v32 }
  0x96   : > { %448 = vmatmul.f32.gmra.mxu0 %v367_v38 }
  0x9e   : > { %451 = vmatmul.f32.gmra.mxu0 %v368_v44 }
  0xa6   : > { %454 = vmatmul.f32.gmra.mxu0 %v369_v49  ;;  %v662_v49 = vld [vmem:[#allocation10 + $0x30] sm:$0xff] }
  0xa7   : > { %685 = vmatpush.msra.mxu2 %v662_v49  ;;  %1160 = vmatpush.msra.mxu3 %v662_v49 }
  0xae   : > { %457 = vmatmul.f32.gmra.mxu0 %v370_v53  ;;  %v661_v53 = vld [vmem:[#allocation10 + $0x28] sm:$0xff] }
  0xaf   : > { %686 = vmatpush.msra.mxu2 %v661_v53  ;;  %1161 = vmatpush.msra.mxu3 %v661_v53 }
  0xb6   : > { %460 = vmatmul.f32.gmra.mxu0 %v371_v54 }
  0xbe   : > { %463 = vmatmul.f32.gmra.mxu0 %v372_v55  ;;  %v660_v55 = vld [vmem:[#allocation10 + $0x20] sm:$0xff] }
  0xbf   : > { %687 = vmatpush.msra.mxu2 %v660_v55  ;;  %1162 = vmatpush.msra.mxu3 %v660_v55 }
  0xc3   : > { %v419_v57 = vpop.f32.mrf.mxu0 }
  0xc4   : > { %v420_v59 = vadd.f32 %v1624_v56, %v419_v57  ;;  %v659_v57 = vld [vmem:[#allocation10 + $0x18] sm:$0xff] }
  0xc5   : > { %688 = vmatpush.msra.mxu2 %v659_v57  ;;  %1163 = vmatpush.msra.mxu3 %v659_v57 }
  0xc6   : > { %v494_v60 = vmax.f32 %v420_v59, 0.0  ;;  %466 = vmatmul.f32.gmra.mxu0 %v373_v58 }
  0xc8   : > { %555 = vmatmul.f32.vlgmr.msra.gmra.mxu1 %v494_v60  ;;  %v658_v60 = vld [vmem:[#allocation10 + $0x10] sm:$0xff] }
  0xc9   : > { %v476_v22 = vpop.f32.mrf.mxu3  ;;  %689 = vmatpush.msra.mxu2 %v658_v60  ;;  %1164 = vmatpush.msra.mxu3 %v658_v60 }
  0xca   : > { %v477_v24 = vadd.f32 %v1624_v56, %v476_v22 }
  0xcb   : > { %v422_v61 = vpop.f32.mrf.mxu0 }
  0xcc   : > { %v423_v63 = vadd.f32 %v1624_v56, %v422_v61  ;;  %v513_v25 = vmax.f32 %v477_v24, 0.0 }
  0xce   : > { %v495_v0 = vmax.f32 %v423_v63, 0.0  ;;  %469 = vmatmul.f32.gmra.mxu0 %v374_v62  ;;  %612 = vmatmul.f32.vlgmr.msrb.gmra.mxu3 %v513_v25 }
  0xd0   : > { %558 = vmatmul.f32.gmra.mxu1 %v495_v0  ;;  %v657_v0 = vld [vmem:[#allocation10 + $0x8] sm:$0xff] }
  0xd1   : > { %v479_v30 = vpop.f32.mrf.mxu3  ;;  %690 = vmatpush.msra.mxu2 %v657_v0  ;;  %1165 = vmatpush.msra.mxu3 %v657_v0 }
  0xd2   : > { %v480_v32 = vadd.f32 %v1624_v56, %v479_v30 }
  0xd3   : > { %v425_v1 = vpop.f32.mrf.mxu0 }
  0xd4   : > { %v426_v3 = vadd.f32 %v1624_v56, %v425_v1  ;;  %v514_v34 = vmax.f32 %v480_v32, 0.0 }
  0xd6   : > { %v496_v4 = vmax.f32 %v426_v3, 0.0  ;;  %472 = vmatmul.f32.gmra.mxu0 %v375_v2  ;;  %615 = vmatmul.f32.gmra.mxu3 %v514_v34  ;;  %v656_v2 = vld [vmem:[#allocation10] sm:$0xff] }
  0xd7   : > { %691 = vmatpush.msra.mxu2 %v656_v2  ;;  %1166 = vmatpush.msra.mxu3 %v656_v2 }
  0xd8   : > { %561 = vmatmul.f32.gmra.mxu1 %v496_v4 }
  0xd9   : > { %v482_v40 = vpop.f32.mrf.mxu3 }
  0xda   : > { %v483_v42 = vadd.f32 %v1624_v56, %v482_v40 }
  0xdb   : > { %v428_v5 = vpop.f32.mrf.mxu0 }
  0xdc   : > { %v429_v6 = vadd.f32 %v1624_v56, %v428_v5  ;;  %v515_v44 = vmax.f32 %v483_v42, 0.0 }
  0xde   : > { %v497_v7 = vmax.f32 %v429_v6, 0.0  ;;  %618 = vmatmul.f32.gmra.mxu3 %v515_v44 }
  0xe0   : > { %564 = vmatmul.f32.gmra.mxu1 %v497_v7 }
  0xe1   : > { %v485_v50 = vpop.f32.mrf.mxu3 }
  0xe2   : > { %v486_v52 = vadd.f32 %v1624_v56, %v485_v50 }
  0xe3   : > { %v431_v8 = vpop.f32.mrf.mxu0 }
  0xe4   : > { %v432_v9 = vadd.f32 %v1624_v56, %v431_v8  ;;  %v516_v54 = vmax.f32 %v486_v52, 0.0 }
  0xe6   : > { %v498_v10 = vmax.f32 %v432_v9, 0.0  ;;  %621 = vmatmul.f32.gmra.mxu3 %v516_v54 }
  0xe8   : > { %567 = vmatmul.f32.gmra.mxu1 %v498_v10 }
  0xe9   : > { %v488_v61 = vpop.f32.mrf.mxu3 }
  0xea   : > { %v489_v63 = vadd.f32 %v1624_v56, %v488_v61 }
  0xeb   : > { %v434_v11 = vpop.f32.mrf.mxu0 }
  0xec   : > { %v435_v12 = vadd.f32 %v1624_v56, %v434_v11  ;;  %v517_v1 = vmax.f32 %v489_v63, 0.0 }
  0xee   : > { %v499_v13 = vmax.f32 %v435_v12, 0.0  ;;  %624 = vmatmul.f32.gmra.mxu3 %v517_v1 }
  0xf0   : > { %570 = vmatmul.f32.gmra.mxu1 %v499_v13 }
  0xf1   : > { %v491_v5 = vpop.f32.mrf.mxu3 }
  0xf2   : > { %v492_v7 = vadd.f32 %v1624_v56, %v491_v5 }
  0xf3   : > { %v437_v14 = vpop.f32.mrf.mxu0 }
  0xf4   : > { %v438_v15 = vadd.f32 %v1624_v56, %v437_v14  ;;  %v518_v8 = vmax.f32 %v492_v7, 0.0 }
  0xf6   : > { %v500_v16 = vmax.f32 %v438_v15, 0.0  ;;  %627 = vmatmul.f32.gmra.mxu3 %v518_v8  ;;  %v1651_v15 = vld [vmem:[%s1871_s4] ss:$0 sm:$0xff] }
  0xf8   : > { %573 = vmatmul.f32.gmra.mxu1 %v500_v16 }
  0xfb   : > { %v440_v17 = vpop.f32.mrf.mxu0 }
  0xfc   : > { %v441_v18 = vadd.f32 %v1624_v56, %v440_v17 }
  0xfe   : > { %v501_v19 = vmax.f32 %v441_v18, 0.0 }
 0x100   : > { %576 = vmatmul.f32.gmra.mxu1 %v501_v19 }
 0x103   : > { %v443_v20 = vpop.f32.mrf.mxu0 }
 0x104   : > { %v444_v21 = vadd.f32 %v1624_v56, %v443_v20 }
 0x106   : > { %v502_v23 = vmax.f32 %v444_v21, 0.0 }
 0x108   : > { %579 = vmatmul.f32.gmra.mxu1 %v502_v23 }
 0x10b   : > { %v446_v27 = vpop.f32.mrf.mxu0 }
 0x10c   : > { %v447_v28 = vadd.f32 %v1624_v56, %v446_v27 }
 0x10e   : > { %v503_v31 = vmax.f32 %v447_v28, 0.0 }
 0x110   : > { %582 = vmatmul.f32.gmra.mxu1 %v503_v31 }
 0x113   : > { %v449_v37 = vpop.f32.mrf.mxu0 }
 0x114   : > { %v450_v38 = vadd.f32 %v1624_v56, %v449_v37 }
 0x116   : > { %v504_v41 = vmax.f32 %v450_v38, 0.0 }
 0x118   : > { %585 = vmatmul.f32.gmra.mxu1 %v504_v41 }
 0x11b   : > { %v452_v47 = vpop.f32.mrf.mxu0 }
 0x11c   : > { %v453_v48 = vadd.f32 %v1624_v56, %v452_v47 }
 0x11e   : > { %v505_v51 = vmax.f32 %v453_v48, 0.0 }
 0x120   : > { %588 = vmatmul.f32.gmra.mxu1 %v505_v51 }
 0x123   : > { %v455_v58 = vpop.f32.mrf.mxu0 }
 0x124   : > { %v456_v59 = vadd.f32 %v1624_v56, %v455_v58 }
 0x126   : > { %v506_v62 = vmax.f32 %v456_v59, 0.0 }
 0x128   : > { %591 = vmatmul.f32.gmra.mxu1 %v506_v62 }
 0x12b   : > { %v458_v3 = vpop.f32.mrf.mxu0 }
 0x12c   : > { %v459_v4 = vadd.f32 %v1624_v56, %v458_v3 }
 0x12e   : > { %v507_v6 = vmax.f32 %v459_v4, 0.0 }
 0x130   : > { %594 = vmatmul.f32.gmra.mxu1 %v507_v6 }
 0x133   : > { %v461_v9 = vpop.f32.mrf.mxu0 }
 0x134   : > { %v462_v10 = vadd.f32 %v1624_v56, %v461_v9 }
 0x136   : > { %v508_v11 = vmax.f32 %v462_v10, 0.0 }
 0x138   : > { %597 = vmatmul.f32.gmra.mxu1 %v508_v11 }
 0x13b   : > { %v464_v12 = vpop.f32.mrf.mxu0 }
 0x13c   : > { %v465_v13 = vadd.f32 %v1624_v56, %v464_v12 }
 0x13e   : > { %v509_v14 = vmax.f32 %v465_v13, 0.0 }
 0x140   : > { %600 = vmatmul.f32.gmra.mxu1 %v509_v14 }
 0x143   : > { %v467_v16 = vpop.f32.mrf.mxu0 }
 0x144   : > { %v468_v17 = vadd.f32 %v1624_v56, %v467_v16 }
 0x145   : > { %v556_v18 = vpop.f32.mrf.mxu1 }
 0x146   : > { %v510_v19 = vmax.f32 %v468_v17, 0.0  ;;  %v557_v20 = vadd.f32 %v1651_v15, %v556_v18 }
 0x148   : > { %v631_v21 = vmax.f32 %v557_v20, 0.0  ;;  %603 = vmatmul.f32.gmra.mxu1 %v510_v19 }
 0x14a   : > { %692 = vmatmul.f32.vlgmr.msra.gmra.mxu2 %v631_v21 }
 0x14b   : > { %v470_v22 = vpop.f32.mrf.mxu0 }
 0x14c   : > { %v471_v23 = vadd.f32 %v1624_v56, %v470_v22 }
 0x14d   : > { %v559_v24 = vpop.f32.mrf.mxu1 }
 0x14e   : > { %v511_v25 = vmax.f32 %v471_v23, 0.0  ;;  %v560_v26 = vadd.f32 %v1651_v15, %v559_v24 }
 0x150   : > { %v632_v27 = vmax.f32 %v560_v26, 0.0  ;;  %606 = vmatmul.f32.gmra.mxu1 %v511_v25 }
 0x151   : > { %v613_v52 = vpop.f32.mrf.mxu3 }
 0x152   : > { %695 = vmatmul.f32.gmra.mxu2 %v632_v27  ;;  %v614_v54 = vadd.f32 %v1651_v15, %v613_v52 }
 0x153   : > { %v473_v28 = vpop.f32.mrf.mxu0 }
 0x154   : > { %v474_v29 = vadd.f32 %v1624_v56, %v473_v28  ;;  %v650_v57 = vmax.f32 %v614_v54, 0.0 }
 0x155   : > { %v562_v30 = vpop.f32.mrf.mxu1 }
 0x156   : > { %v512_v31 = vmax.f32 %v474_v29, 0.0  ;;  %v563_v32 = vadd.f32 %v1651_v15, %v562_v30  ;;  %749 = vmatmul.f32.vlgmr.msra.gmra.mxu3 %v650_v57 }
 0x158   : > { %v633_v33 = vmax.f32 %v563_v32, 0.0  ;;  %609 = vmatmul.f32.gmra.mxu1 %v512_v31  ;;  %v1252_v31 = vld [vmem:[%s1873_s6] ss:$0 sm:$0xff] }
 0x159   : > { %v616_v59 = vpop.f32.mrf.mxu3 }
 0x15a   : > { %698 = vmatmul.f32.gmra.mxu2 %v633_v33  ;;  %v617_v61 = vadd.f32 %v1651_v15, %v616_v59 }
 0x15c   : > { %v651_v63 = vmax.f32 %v617_v61, 0.0 }
 0x15d   : > { %v565_v34 = vpop.f32.mrf.mxu1 }
 0x15e   : > { %v566_v35 = vadd.f32 %v1651_v15, %v565_v34  ;;  %752 = vmatmul.f32.gmra.mxu3 %v651_v63 }
 0x160   : > { %v634_v36 = vmax.f32 %v566_v35, 0.0 }
 0x161   : > { %v619_v1 = vpop.f32.mrf.mxu3 }
 0x162   : > { %701 = vmatmul.f32.gmra.mxu2 %v634_v36  ;;  %v620_v3 = vadd.f32 %v1651_v15, %v619_v1 }
 0x164   : > { %v652_v5 = vmax.f32 %v620_v3, 0.0 }
 0x165   : > { %v568_v37 = vpop.f32.mrf.mxu1 }
 0x166   : > { %v569_v38 = vadd.f32 %v1651_v15, %v568_v37  ;;  %755 = vmatmul.f32.gmra.mxu3 %v652_v5 }
 0x168   : > { %v635_v39 = vmax.f32 %v569_v38, 0.0 }
 0x169   : > { %v622_v7 = vpop.f32.mrf.mxu3 }
 0x16a   : > { %704 = vmatmul.f32.gmra.mxu2 %v635_v39  ;;  %v623_v9 = vadd.f32 %v1651_v15, %v622_v7 }
 0x16c   : > { %v653_v11 = vmax.f32 %v623_v9, 0.0 }
 0x16d   : > { %v571_v40 = vpop.f32.mrf.mxu1 }
 0x16e   : > { %v572_v56 = vadd.f32 %v1651_v15, %v571_v40  ;;  %758 = vmatmul.f32.gmra.mxu3 %v653_v11 }
 0x170   : > { %v636_v41 = vmax.f32 %v572_v56, 0.0 }
 0x171   : > { %v625_v13 = vpop.f32.mrf.mxu3 }
 0x172   : > { %707 = vmatmul.f32.gmra.mxu2 %v636_v41  ;;  %v626_v16 = vadd.f32 %v1651_v15, %v625_v13 }
 0x174   : > { %v654_v18 = vmax.f32 %v626_v16, 0.0 }
 0x175   : > { %v574_v42 = vpop.f32.mrf.mxu1 }
 0x176   : > { %v575_v43 = vadd.f32 %v1651_v15, %v574_v42  ;;  %761 = vmatmul.f32.gmra.mxu3 %v654_v18 }
 0x178   : > { %v637_v44 = vmax.f32 %v575_v43, 0.0 }
 0x179   : > { %v628_v20 = vpop.f32.mrf.mxu3 }
 0x17a   : > { %710 = vmatmul.f32.gmra.mxu2 %v637_v44  ;;  %v629_v22 = vadd.f32 %v1651_v15, %v628_v20 }
 0x17c   : > { %v655_v24 = vmax.f32 %v629_v22, 0.0 }
 0x17d   : > { %v577_v45 = vpop.f32.mrf.mxu1 }
 0x17e   : > { %v578_v46 = vadd.f32 %v1651_v15, %v577_v45  ;;  %764 = vmatmul.f32.gmra.mxu3 %v655_v24 }
 0x180   : > { %v638_v47 = vmax.f32 %v578_v46, 0.0 }
 0x182   : > { %713 = vmatmul.f32.gmra.mxu2 %v638_v47 }
 0x185   : > { %v580_v48 = vpop.f32.mrf.mxu1 }
 0x186   : > { %v581_v49 = vadd.f32 %v1651_v15, %v580_v48 }
 0x188   : > { %v639_v50 = vmax.f32 %v581_v49, 0.0 }
 0x18a   : > { %716 = vmatmul.f32.gmra.mxu2 %v639_v50 }
 0x18d   : > { %v583_v51 = vpop.f32.mrf.mxu1 }
 0x18e   : > { %v584_v53 = vadd.f32 %v1651_v15, %v583_v51 }
 0x190   : > { %v640_v55 = vmax.f32 %v584_v53, 0.0 }
 0x192   : > { %719 = vmatmul.f32.gmra.mxu2 %v640_v55 }
 0x195   : > { %v586_v58 = vpop.f32.mrf.mxu1 }
 0x196   : > { %v587_v60 = vadd.f32 %v1651_v15, %v586_v58 }
 0x198   : > { %v641_v62 = vmax.f32 %v587_v60, 0.0 }
 0x19a   : > { %722 = vmatmul.f32.gmra.mxu2 %v641_v62 }
 0x19d   : > { %v589_v0 = vpop.f32.mrf.mxu1 }
 0x19e   : > { %v590_v2 = vadd.f32 %v1651_v15, %v589_v0 }
 0x1a0   : > { %v642_v4 = vmax.f32 %v590_v2, 0.0 }
 0x1a2   : > { %725 = vmatmul.f32.gmra.mxu2 %v642_v4 }
 0x1a5   : > { %v592_v6 = vpop.f32.mrf.mxu1 }
 0x1a6   : > { %v593_v8 = vadd.f32 %v1651_v15, %v592_v6 }
 0x1a8   : > { %v643_v10 = vmax.f32 %v593_v8, 0.0 }
 0x1aa   : > { %728 = vmatmul.f32.gmra.mxu2 %v643_v10 }
 0x1ad   : > { %v595_v12 = vpop.f32.mrf.mxu1 }
 0x1ae   : > { %v596_v14 = vadd.f32 %v1651_v15, %v595_v12 }
 0x1b0   : > { %v644_v17 = vmax.f32 %v596_v14, 0.0 }
 0x1b2   : > { %731 = vmatmul.f32.gmra.mxu2 %v644_v17 }
 0x1b5   : > { %v598_v19 = vpop.f32.mrf.mxu1 }
 0x1b6   : > { %v599_v21 = vadd.f32 %v1651_v15, %v598_v19 }
 0x1b8   : > { %v645_v23 = vmax.f32 %v599_v21, 0.0 }
 0x1ba   : > { %734 = vmatmul.f32.gmra.mxu2 %v645_v23 }
 0x1bd   : > { %v601_v25 = vpop.f32.mrf.mxu1 }
 0x1be   : > { %v602_v26 = vadd.f32 %v1651_v15, %v601_v25 }
 0x1c0   : > { %v646_v27 = vmax.f32 %v602_v26, 0.0 }
 0x1c2   : > { %737 = vmatmul.f32.gmra.mxu2 %v646_v27 }
 0x1c5   : > { %v604_v28 = vpop.f32.mrf.mxu1 }
 0x1c6   : > { %v605_v29 = vadd.f32 %v1651_v15, %v604_v28 }
 0x1c8   : > { %v647_v30 = vmax.f32 %v605_v29, 0.0 }
 0x1ca   : > { %740 = vmatmul.f32.gmra.mxu2 %v647_v30 }
 0x1cd   : > { %v607_v32 = vpop.f32.mrf.mxu1  ;;  %v693_v33 = vpop.f32.mrf.mxu2 }
 0x1ce   : > { %v608_v34 = vadd.f32 %v1651_v15, %v607_v32  ;;  %v1683_v35 = vadd.f32 %v1252_v31, %v693_v33 }
 0x1d0   : > { %v648_v36 = vmax.f32 %v608_v34, 0.0 }
 0x1d2   : > { %743 = vmatmul.f32.gmra.mxu2 %v648_v36 }
 0x1d5   : > { %v610_v37 = vpop.f32.mrf.mxu1  ;;  %v696_v38 = vpop.f32.mrf.mxu2 }
 0x1d6   : > { %v611_v39 = vadd.f32 %v1651_v15, %v610_v37  ;;  %v1686_v40 = vadd.f32 %v1252_v31, %v696_v38 }
 0x1d8   : > { %v649_v56 = vmax.f32 %v611_v39, 0.0 }
 0x1d9   : > { %v750_v55 = vpop.f32.mrf.mxu3 }
 0x1da   : > { %746 = vmatmul.f32.gmra.mxu2 %v649_v56  ;;  %v1704_v58 = vadd.f32 %v1252_v31, %v750_v55 }
 0x1dd   : > { %v699_v41 = vpop.f32.mrf.mxu2 }
 0x1de   : > { %v1688_v42 = vadd.f32 %v1252_v31, %v699_v41 }
 0x1e1   : > { %v753_v60 = vpop.f32.mrf.mxu3 }
 0x1e2   : > { %v1708_v62 = vadd.f32 %v1252_v31, %v753_v60 }
 0x1e5   : > { %v702_v43 = vpop.f32.mrf.mxu2 }
 0x1e6   : > { %v1690_v44 = vadd.f32 %v1252_v31, %v702_v43 }
 0x1e9   : > { %v756_v0 = vpop.f32.mrf.mxu3 }
 0x1ea   : > { %v1712_v2 = vadd.f32 %v1252_v31, %v756_v0 }
 0x1ed   : > { %v705_v45 = vpop.f32.mrf.mxu2 }
 0x1ee   : > { %v1692_v46 = vadd.f32 %v1252_v31, %v705_v45 }
 0x1f1   : > { %v759_v4 = vpop.f32.mrf.mxu3 }
 0x1f2   : > { %v1716_v6 = vadd.f32 %v1252_v31, %v759_v4 }
 0x1f5   : > { %v708_v47 = vpop.f32.mrf.mxu2 }
 0x1f6   : > { %v1694_v48 = vadd.f32 %v1252_v31, %v708_v47 }
 0x1f9   : > { %v762_v8 = vpop.f32.mrf.mxu3 }
 0x1fa   : > { %v1720_v10 = vadd.f32 %v1252_v31, %v762_v8 }
 0x1fd   : > { %v711_v49 = vpop.f32.mrf.mxu2 }
 0x1fe   : > { %v1696_v50 = vadd.f32 %v1252_v31, %v711_v49 }
 0x201   : > { %v765_v12 = vpop.f32.mrf.mxu3 }
 0x202   : > { %v1724_v14 = vadd.f32 %v1252_v31, %v765_v12 }
 0x205   : > { %v714_v15 = vpop.f32.mrf.mxu2 }
 0x206   : > { %v1698_v51 = vadd.f32 %v1252_v31, %v714_v15 }
 0x20d   : > { %v717_v52 = vpop.f32.mrf.mxu2 }
 0x20e   : > { %v1700_v53 = vadd.f32 %v1252_v31, %v717_v52 }
 0x215   : > { %v720_v54 = vpop.f32.mrf.mxu2 }
 0x216   : > { %v1702_v57 = vadd.f32 %v1252_v31, %v720_v54 }
 0x21d   : > { %v723_v59 = vpop.f32.mrf.mxu2 }
 0x21e   : > { %v1706_v61 = vadd.f32 %v1252_v31, %v723_v59 }
 0x225   : > { %v726_v63 = vpop.f32.mrf.mxu2 }
 0x226   : > { %v1710_v1 = vadd.f32 %v1252_v31, %v726_v63 }
 0x22d   : > { %v729_v3 = vpop.f32.mrf.mxu2 }
 0x22e   : > { %v1714_v5 = vadd.f32 %v1252_v31, %v729_v3 }
 0x235   : > { %v732_v7 = vpop.f32.mrf.mxu2 }
 0x236   : > { %v1718_v9 = vadd.f32 %v1252_v31, %v732_v7 }
 0x23d   : > { %v735_v11 = vpop.f32.mrf.mxu2 }
 0x23e   : > { %v1722_v13 = vadd.f32 %v1252_v31, %v735_v11 }
 0x245   : > { %v738_v16 = vpop.f32.mrf.mxu2 }
 0x246   : > { %v1726_v17 = vadd.f32 %v1252_v31, %v738_v16 }
 0x24d   : > { %v741_v18 = vpop.f32.mrf.mxu2 }
 0x24e   : > { %v1728_v19 = vadd.f32 %v1252_v31, %v741_v18 }
 0x255   : > { %v744_v20 = vpop.f32.mrf.mxu2 }
 0x256   : > { %v1730_v21 = vadd.f32 %v1252_v31, %v744_v20 }
 0x25a   : > { %770 = sbr.rel (%p1112_p8) target bundleno = 714 (0x2ca), region = 72 }
 0x25d   : > { %v747_v22 = vpop.f32.mrf.mxu2 }
 0x25e   : > { %v1732_v23 = vadd.f32 %v1252_v31, %v747_v22 }
 0x25f   : > { %v771_v24 = vmax.f32 %v1683_v35, %v1692_v46  ;;  %v772_v25 = vmax.f32 %v1686_v40, %v1694_v48  ;;  %v773_v26 = vmax.f32 %v1688_v42, %v1696_v50  ;;  %v774_v27 = vmax.f32 %v1690_v44, %v1698_v51  ;;  %v1760_v3 = vld [vmem:[#allocation2] sm:$0x1] }
 0x261   : > { %v775_v28 = vmax.f32 %v771_v24, %v1700_v53  ;;  %v776_v29 = vmax.f32 %v772_v25, %v1702_v57  ;;  %v777_v30 = vmax.f32 %v773_v26, %v1706_v61  ;;  %v778_v31 = vmax.f32 %v774_v27, %v1710_v1 }
 0x263   : > { %v779_v32 = vmax.f32 %v775_v28, %v1714_v5  ;;  %v780_v33 = vmax.f32 %v776_v29, %v1718_v9  ;;  %v781_v34 = vmax.f32 %v777_v30, %v1722_v13  ;;  %v782_v36 = vmax.f32 %v778_v31, %v1726_v17 }
 0x265   : > { %v783_v37 = vmax.f32 %v779_v32, %v1728_v19  ;;  %v784_v38 = vmax.f32 %v780_v33, %v1730_v21  ;;  %v785_v39 = vmax.f32 %v781_v34, %v1732_v23  ;;  %v786_v56 = vmax.f32 %v782_v36, %v1704_v58 }
 0x267   : > { %v787_v41 = vmax.f32 %v783_v37, %v1708_v62  ;;  %v788_v43 = vmax.f32 %v784_v38, %v1712_v2  ;;  %v789_v45 = vmax.f32 %v785_v39, %v1716_v6  ;;  %v790_v47 = vmax.f32 %v786_v56, %v1720_v10 }
 0x269   : > { %v791_v49 = vmax.f32 %v787_v41, %v1724_v14  ;;  %v793_v15 = vmax.f32 %v789_v45, %v790_v47 }
 0x26b   : > { %v792_v52 = vmax.f32 %v791_v49, %v788_v43 }
 0x26d   : > { %v794_v54 = vmax.f32 %v792_v52, %v793_v15 }
 0x26f   : > { %v795_v55 = vrot.slane %v794_v54, 4 }
 0x271   : > { %v796_v59 = vmax.f32 %v794_v54, %v795_v55 }
 0x273   : > { %v797_v60 = vrot.slane %v796_v59, 2 }
 0x275   : > { %v798_v63 = vmax.f32 %v796_v59, %v797_v60 }
 0x277   : > { %v799_v0 = vrot.slane %v798_v63, 1 }
 0x279   : > { %v800_v4 = vmax.f32 %v798_v63, %v799_v0 }
 0x27b   : > { %v1763_v7 = vmax.f32 %v1760_v3, %v800_v4 }
 0x27d   : > { %v804_v8 = vsub.f32 %v1760_v3, %v1763_v7  ;;  %v1768_v11 = vperm.slane %v1763_v7, 0  ;;  %918 = vst [vmem:[#allocation2] sm:$0x1] %v1763_v7 }
 0x27f   : > { %v811_v12 = vsub.f32 %v1683_v35, %v1768_v11  ;;  %v812_v16 = vsub.f32 %v1686_v40, %v1768_v11  ;;  %v813_v18 = vsub.f32 %v1688_v42, %v1768_v11  ;;  %v814_v20 = vsub.f32 %v1690_v44, %v1768_v11 }
 0x280   : > { %v815_v22 = vsub.f32 %v1692_v46, %v1768_v11  ;;  %v816_v25 = vsub.f32 %v1694_v48, %v1768_v11  ;;  %v817_v29 = vsub.f32 %v1696_v50, %v1768_v11  ;;  %v818_v31 = vsub.f32 %v1698_v51, %v1768_v11 }
 0x281   : > { %v836_v24 = vmul.f32 1.442695, %v811_v12  ;;  %v838_v26 = vmul.f32 1.442695, %v812_v16  ;;  %v840_v27 = vmul.f32 1.442695, %v813_v18  ;;  %v819_v33 = vsub.f32 %v1700_v53, %v1768_v11 }
 0x282   : > { %v842_v28 = vmul.f32 1.442695, %v814_v20  ;;  %v844_v30 = vmul.f32 1.442695, %v815_v22  ;;  %v846_v32 = vmul.f32 1.442695, %v816_v25  ;;  %v820_v38 = vsub.f32 %v1702_v57, %v1768_v11 }
 0x283   : > { %1253 = vpow2.f32 %v836_v24  ;;  %v848_v34 = vmul.f32 1.442695, %v817_v29  ;;  %v850_v39 = vmul.f32 1.442695, %v818_v31  ;;  %v821_v45 = vsub.f32 %v1706_v61, %v1768_v11 }
 0x284   : > { %1255 = vpow2.f32 %v838_v26  ;;  %v852_v47 = vmul.f32 1.442695, %v819_v33  ;;  %v822_v52 = vsub.f32 %v1710_v1, %v1768_v11  ;;  %v854_v54 = vmul.f32 1.442695, %v820_v38 }
 0x285   : > { %1257 = vpow2.f32 %v840_v27  ;;  %v823_v60 = vsub.f32 %v1714_v5, %v1768_v11  ;;  %v856_v63 = vmul.f32 1.442695, %v821_v45  ;;  %v824_v12 = vsub.f32 %v1718_v9, %v1768_v11 }
 0x286   : > { %1259 = vpow2.f32 %v842_v28  ;;  %v858_v16 = vmul.f32 1.442695, %v822_v52  ;;  %v825_v22 = vsub.f32 %v1722_v13, %v1768_v11  ;;  %v826_v27 = vsub.f32 %v1726_v17, %v1768_v11 }
 0x287   : > { %1261 = vpow2.f32 %v844_v30  ;;  %v860_v24 = vmul.f32 1.442695, %v823_v60  ;;  %v862_v28 = vmul.f32 1.442695, %v824_v12  ;;  %v827_v31 = vsub.f32 %v1728_v19, %v1768_v11 }
 0x288   : > { %1263 = vpow2.f32 %v846_v32  ;;  %v864_v32 = vmul.f32 1.442695, %v825_v22 }
 0x289   : > { %v1254_v36 = vpop.eup %1253  ;;  %1265 = vpow2.f32 %v848_v34 }
 0x28a   : > { %v1256_v37 = vpop.eup %1255  ;;  %1267 = vpow2.f32 %v850_v39 }
 0x28b   : > { %v1258_v56 = vpop.eup %1257  ;;  %v886_v41 = vadd.f32 %v1256_v37, %v1254_v36  ;;  %1269 = vpow2.f32 %v852_v47  ;;  %v828_v36 = vsub.f32 %v1730_v21, %v1768_v11  ;;  %v866_v37 = vmul.f32 1.442695, %v826_v27 }
 0x28c   : > { %v1260_v43 = vpop.eup %1259  ;;  %1271 = vpow2.f32 %v854_v54  ;;  %v830_v47 = vsub.f32 %v1704_v58, %v1768_v11  ;;  %v831_v54 = vsub.f32 %v1708_v62, %v1768_v11 }
 0x28d   : > { %v887_v49 = vadd.f32 %v1258_v56, %v886_v41  ;;  %v1262_v15 = vpop.eup %1261  ;;  %1273 = vpow2.f32 %v856_v63  ;;  %v829_v56 = vsub.f32 %v1732_v23, %v1768_v11  ;;  %v868_v41 = vmul.f32 1.442695, %v827_v31 }
 0x28e   : > { %v1264_v59 = vpop.eup %1263  ;;  %1275 = vpow2.f32 %v858_v16  ;;  %v832_v63 = vsub.f32 %v1712_v2, %v1768_v11  ;;  %v833_v16 = vsub.f32 %v1716_v6, %v1768_v11 }
 0x28f   : > { %v888_v55 = vadd.f32 %v1260_v43, %v887_v49  ;;  %v1266_v4 = vpop.eup %1265  ;;  %1277 = vpow2.f32 %v860_v24  ;;  %v870_v49 = vmul.f32 1.442695, %v828_v36  ;;  %v834_v24 = vsub.f32 %v1720_v10, %v1768_v11 }
 0x290   : > { %v1268_v20 = vpop.eup %1267  ;;  %1279 = vpow2.f32 %v862_v28  ;;  %v835_v28 = vsub.f32 %v1724_v14, %v1768_v11 }
 0x291   : > { %v889_v0 = vadd.f32 %v1262_v15, %v888_v55  ;;  %v1270_v26 = vpop.eup %1269  ;;  %1281 = vpow2.f32 %v864_v32  ;;  %v872_v55 = vmul.f32 1.442695, %v829_v56  ;;  %v882_v32 = vmul.f32 1.442695, %v834_v24 }
 0x292   : > { %v1272_v30 = vpop.eup %1271  ;;  %1283 = vpow2.f32 %v866_v37  ;;  %v884_v36 = vmul.f32 1.442695, %v835_v28 }
 0x293   : > { %v890_v18 = vadd.f32 %v1264_v59, %v889_v0  ;;  %v1274_v34 = vpop.eup %1273  ;;  %1285 = vpow2.f32 %v868_v41  ;;  %v874_v0 = vmul.f32 1.442695, %v830_v47 }
 0x294   : > { %v1276_v39 = vpop.eup %1275  ;;  %1287 = vpow2.f32 %v870_v49 }
 0x295   : > { %v891_v25 = vadd.f32 %v1266_v4, %v890_v18  ;;  %v1278_v45 = vpop.eup %1277  ;;  %1289 = vpow2.f32 %v872_v55  ;;  %v876_v18 = vmul.f32 1.442695, %v831_v54 }
 0x296   : > { %v1280_v52 = vpop.eup %1279  ;;  %1291 = vpow2.f32 %v874_v0  ;;  %v803_v0 = vld [vmem:[#allocation3] sm:$0x1] }
 0x297   : > { %v892_v29 = vadd.f32 %v1268_v20, %v891_v25  ;;  %v1282_v60 = vpop.eup %1281  ;;  %v878_v25 = vmul.f32 1.442695, %v832_v63  ;;  %1293 = vpow2.f32 %v876_v18 }
 0x298   : > { %v1284_v12 = vpop.eup %1283 }
 0x299   : > { %v893_v33 = vadd.f32 %v1270_v26, %v892_v29  ;;  %v1286_v22 = vpop.eup %1285  ;;  %v880_v29 = vmul.f32 1.442695, %v833_v16  ;;  %1295 = vpow2.f32 %v878_v25 }
 0x29a   : > { %v1288_v27 = vpop.eup %1287 }
 0x29b   : > { %v894_v38 = vadd.f32 %v1272_v30, %v893_v33  ;;  %v1290_v31 = vpop.eup %1289  ;;  %1297 = vpow2.f32 %v880_v29 }
 0x29c   : > { %1299 = vpow2.f32 %v882_v32 }
 0x29d   : > { %v895_v43 = vadd.f32 %v1274_v34, %v894_v38  ;;  %v1292_v34 = vpop.eup %1291  ;;  %1301 = vpow2.f32 %v884_v36 }
 0x29e   : > { %v1294_v38 = vpop.eup %1293 }
 0x29f   : > { %v896_v15 = vadd.f32 %v1276_v39, %v895_v43  ;;  %v1296_v56 = vpop.eup %1295 }
 0x2a1   : > { %v897_v59 = vadd.f32 %v1278_v45, %v896_v15  ;;  %v1298_v43 = vpop.eup %1297  ;;  %v805_v15 = vmul.f32 1.442695, %v804_v8 }
 0x2a2   : > { %v1300_v11 = vpop.eup %1299 }
 0x2a3   : > { %v898_v4 = vadd.f32 %v1280_v52, %v897_v59  ;;  %v1302_v49 = vpop.eup %1301  ;;  %1303 = vpow2.f32 %v805_v15 }
 0x2a5   : > { %v899_v20 = vadd.f32 %v1282_v60, %v898_v4 }
 0x2a7   : > { %v900_v26 = vadd.f32 %v1284_v12, %v899_v20 }
 0x2a9   : > { %v901_v30 = vadd.f32 %v1286_v22, %v900_v26  ;;  %v1304_v63 = vpop.eup %1303 }
 0x2aa   : > { %v807_v12 = vmul.f32 %v1304_v63, %v803_v0 }
 0x2ab   : > { %v902_v33 = vadd.f32 %v1288_v27, %v901_v30 }
 0x2ad   : > { %v903_v37 = vadd.f32 %v1290_v31, %v902_v33 }
 0x2af   : > { %v904_v39 = vadd.f32 %v1292_v34, %v903_v37 }
 0x2b1   : > { %v905_v41 = vadd.f32 %v1294_v38, %v904_v39 }
 0x2b3   : > { %v906_v45 = vadd.f32 %v1296_v56, %v905_v41 }
 0x2b5   : > { %v907_v47 = vadd.f32 %v1298_v43, %v906_v45 }
 0x2b7   : > { %v908_v52 = vadd.f32 %v1300_v11, %v907_v47 }
 0x2b9   : > { %v909_v54 = vadd.f32 %v1302_v49, %v908_v52 }
 0x2bb   : > { %v910_v55 = vrot.slane %v909_v54, 4 }
 0x2bd   : > { %v911_v59 = vadd.f32 %v910_v55, %v909_v54 }
 0x2bf   : > { %v912_v60 = vrot.slane %v911_v59, 2 }
 0x2c1   : > { %v913_v4 = vadd.f32 %v912_v60, %v911_v59 }
 0x2c3   : > { %v914_v16 = vrot.slane %v913_v4, 1 }
 0x2c5   : > { %v915_v18 = vadd.f32 %v914_v16, %v913_v4 }
 0x2c7   : > { %v916_v20 = vadd.f32 %v915_v18, %v807_v12 }
 0x2c9   : > { %917 = vst [vmem:[#allocation3] sm:$0x1] %v916_v20 }
 0x2ca PF: > { %p1113_p9 = scmp.ne.s32.totalorder %s1485_s24, 1 }
 0x2cc   : > { %922 = sbr.rel (%p1113_p9) target bundleno = 762 (0x2fa), region = 76 }
 0x2d1   : > { %v924_v3 = vld [vmem:[#allocation3] sm:$0x1]  ;;  %v923_v8 = vld [vmem:[#allocation2] sm:$0x1] }
 0x2d2   : > { %1305 = vlog2.f32 %v924_v3 }
 0x2d8   : > { %v1306_v7 = vpop.eup %1305 }
 0x2d9   : > { %v926_v22 = vmul.f32 0.6931472, %v1306_v7 }
 0x2db   : > { %v927_v24 = vadd.f32 %v926_v22, %v923_v8 }
 0x2dd   : > { %v929_v25 = vperm.slane %v927_v24, 0 }
 0x2df   : > { %v931_v26 = vsub.f32 %v1683_v35, %v929_v25  ;;  %v932_v27 = vsub.f32 %v1686_v40, %v929_v25  ;;  %v933_v28 = vsub.f32 %v1688_v42, %v929_v25  ;;  %v934_v29 = vsub.f32 %v1690_v44, %v929_v25 }
 0x2e0   : > { %v935_v30 = vsub.f32 %v1692_v46, %v929_v25  ;;  %v936_v31 = vsub.f32 %v1694_v48, %v929_v25  ;;  %v937_v32 = vsub.f32 %v1696_v50, %v929_v25  ;;  %v938_v33 = vsub.f32 %v1698_v51, %v929_v25 }
 0x2e1   : > { %956 = vst [vmem:[#allocation12] sm:$0xff] %v931_v26  ;;  %v939_v35 = vsub.f32 %v1700_v53, %v929_v25  ;;  %v940_v40 = vsub.f32 %v1702_v57, %v929_v25  ;;  %v941_v42 = vsub.f32 %v1706_v61, %v929_v25  ;;  %v942_v44 = vsub.f32 %v1710_v1, %v929_v25 }
 0x2e2   : > { %957 = vst [vmem:[#allocation12 + $0x8] sm:$0xff] %v932_v27  ;;  %v943_v46 = vsub.f32 %v1714_v5, %v929_v25  ;;  %v944_v48 = vsub.f32 %v1718_v9, %v929_v25  ;;  %v945_v50 = vsub.f32 %v1722_v13, %v929_v25  ;;  %v946_v51 = vsub.f32 %v1726_v17, %v929_v25 }
 0x2e3   : > { %958 = vst [vmem:[#allocation12 + $0x10] sm:$0xff] %v933_v28  ;;  %v947_v53 = vsub.f32 %v1728_v19, %v929_v25  ;;  %v948_v57 = vsub.f32 %v1730_v21, %v929_v25  ;;  %v949_v61 = vsub.f32 %v1732_v23, %v929_v25  ;;  %v950_v1 = vsub.f32 %v1704_v58, %v929_v25 }
 0x2e4   : > { %959 = vst [vmem:[#allocation12 + $0x18] sm:$0xff] %v934_v29  ;;  %v951_v5 = vsub.f32 %v1708_v62, %v929_v25  ;;  %v952_v9 = vsub.f32 %v1712_v2, %v929_v25  ;;  %v953_v13 = vsub.f32 %v1716_v6, %v929_v25  ;;  %v954_v17 = vsub.f32 %v1720_v10, %v929_v25 }
 0x2e5   : > { %960 = vst [vmem:[#allocation12 + $0x20] sm:$0xff] %v935_v30  ;;  %v955_v19 = vsub.f32 %v1724_v14, %v929_v25 }
 0x2e6   : > { %961 = vst [vmem:[#allocation12 + $0x28] sm:$0xff] %v936_v31 }
 0x2e7   : > { %962 = vst [vmem:[#allocation12 + $0x30] sm:$0xff] %v937_v32 }
 0x2e8   : > { %963 = vst [vmem:[#allocation12 + $0x38] sm:$0xff] %v938_v33 }
 0x2e9   : > { %964 = vst [vmem:[#allocation12 + $0x40] sm:$0xff] %v939_v35 }
 0x2ea   : > { %965 = vst [vmem:[#allocation12 + $0x48] sm:$0xff] %v940_v40 }
 0x2eb   : > { %966 = vst [vmem:[#allocation12 + $0x50] sm:$0xff] %v941_v42 }
 0x2ec   : > { %967 = vst [vmem:[#allocation12 + $0x58] sm:$0xff] %v942_v44 }
 0x2ed   : > { %968 = vst [vmem:[#allocation12 + $0x60] sm:$0xff] %v943_v46 }
 0x2ee   : > { %969 = vst [vmem:[#allocation12 + $0x68] sm:$0xff] %v944_v48 }
 0x2ef   : > { %970 = vst [vmem:[#allocation12 + $0x70] sm:$0xff] %v945_v50 }
 0x2f0   : > { %971 = vst [vmem:[#allocation12 + $0x78] sm:$0xff] %v946_v51 }
 0x2f1   : > { %972 = vst [vmem:[#allocation12 + $0x80] sm:$0xff] %v947_v53 }
 0x2f2   : > { %973 = vst [vmem:[#allocation12 + $0x88] sm:$0xff] %v948_v57 }
 0x2f3   : > { %974 = vst [vmem:[#allocation12 + $0x90] sm:$0xff] %v949_v61 }
 0x2f4   : > { %975 = vst [vmem:[#allocation12 + $0x98] sm:$0xff] %v950_v1 }
 0x2f5   : > { %976 = vst [vmem:[#allocation12 + $0xa0] sm:$0xff] %v951_v5 }
 0x2f6   : > { %977 = vst [vmem:[#allocation12 + $0xa8] sm:$0xff] %v952_v9 }
 0x2f7   : > { %978 = vst [vmem:[#allocation12 + $0xb0] sm:$0xff] %v953_v13 }
 0x2f8   : > { %979 = vst [vmem:[#allocation12 + $0xb8] sm:$0xff] %v954_v17 }
 0x2f9   : > { %980 = vst [vmem:[#allocation12 + $0xc0] sm:$0xff] %v955_v19 }
 0x2fa PF: > { %p1212_p10 = scmp.eq.s32.totalorder %s1099_s27, 1  ;;  %s997_s22 = sshll.u32 %s1874_s7, 4  ;;  %s998_s22 = int_to_ptr.hbm [resolvable:$true] %s997_s22 }
 0x2fb   : > { %s1503_s23 = smov [#allocation12]   ;;  %s1504_s9 = smov 128  }
 0x2fc   : > { %s995_s8 = sshll.u32 %s1503_s23, 4  ;;  %s1505_s10 = smov 8   ;;  %s996_s8 = int_to_ptr.vmem [resolvable:$true] %s995_s8 }
 0x2fd   : > { %1184 = dma.vmem_to_hbm [thread:$0]  (%p1212_p10), %s996_s8, 3200, %s998_s22, [#allocation6], %s1504_s9, %s1504_s9, %s1505_s10  }
 0x2fe PF: > { %p1213_p11 = scmp.ge.s32.totalorder %s1493_s26, 2  ;;  %p1214_p12 = scmp.eq.s32.totalorder %s1100_s28, 1 }
 0x300   : > { %p1201_p13 = pnand %p1214_p12, %p1213_p11 }
 0x302   : > { %p1202_p0 = pneg %p1201_p13 }
 0x304   : > { %1480 = dma.done.wait (%p1202_p0), [#allocation6], 3200  }
 0x305   : > { %1482 = vsyncadd (%p1202_p0), [#allocation6], 4294964096  ;;  %s23_s26 = sadd.s32 1, %s1493_s26   ;;  %s1878_s24 = smov %s1489_s25 }
 0x306   : > { %p20_p1 = scmp.ge.s32.totalorder %s23_s26, 4   ;;  %s1879_s25 = smov %s1881_s14 }
 0x308   :  { %22 = sbr.rel (!%p20_p1) target bundleno = 6 (0x6), region = 110 }
 0x30d   :  { %1019 = vsyncpa [#allocation5], 1 }
 0x30e   :  { %1021 = vsyncpa [#allocation5 + $0x1], 1 }
 0x30f   :  { %1022 = vsyncpa [#allocation8], 1 }
 0x310   :  { %1023 = vsyncpa [#allocation11], 1 }
 0x311   :  { %1024 = vsyncpa [#allocation6], 1 }
 0x312   :  { %1026 = vsyncpa [#allocation6 + $0x1], 1 }

</bundles_post_ra>
